<compile_context>
chip_gen: v7x
topology: tpu7x:2x2x1
jax: 0.10.0
libtpu: 0.0.40
codegen_flags: <defaults>
</compile_context>

<pallas_src>
import numpy as np
import jax
import jax.numpy as jnp
from jax import lax
from jax.experimental import pallas as pl
from jax.experimental.pallas import tpu as pltpu


def mf_kernel(u_idx_ref, v_idx_ref,    # (1, TB) int32 index tiles (VMEM)
              u_tab_ref, v_tab_ref,    # (E, U), (E, V) f32 tables, VMEM-resident
              o_ref):                  # (1, TB) f32 output tile
    u_ids = u_idx_ref[...]             # (1, TB) int32
    v_ids = v_idx_ref[...]             # (1, TB) int32

    e_dim, n_users = u_tab_ref.shape
    _, n_items = v_tab_ref.shape
    tb = u_ids.shape[1]

    # One-hot gather on the MXU: table^T (E, U) @ onehot (U, TB) -> (E, TB).
    u_rows = lax.broadcasted_iota(jnp.int32, (n_users, tb), 0)
    onehot_u = (u_rows == u_ids).astype(u_tab_ref.dtype)           # (U, TB)
    u_cols = jnp.dot(u_tab_ref[...], onehot_u,
                     preferred_element_type=jnp.float32)            # (E, TB)

    v_rows = lax.broadcasted_iota(jnp.int32, (n_items, tb), 0)
    onehot_v = (v_rows == v_ids).astype(v_tab_ref.dtype)            # (V, TB)
    v_cols = jnp.dot(v_tab_ref[...], onehot_v,
                     preferred_element_type=jnp.float32)            # (E, TB)

    # Full-lane VPU product, sublane reduce -> lane-dense (1, TB) store.
    o_ref[...] = jnp.sum(u_cols * v_cols, axis=0, keepdims=True)


def mf_forward(u_idx, v_idx, user_emb, item_emb, *, tile_b=512):
    """Pallas implementation of MF.forward.

    Args:
      u_idx: int (B,) user indices.
      v_idx: int (B,) item indices.
      user_emb: float32 (num_users, E) embedding table.
      item_emb: float32 (num_items, E) embedding table.
      tile_b: batch-tile size (rounded to a multiple of 128, clamped to the
        padded batch).  512-1024 recommended for large batches.
    Returns:
      float32 (B,) per-example dot products.
    """
    B = int(u_idx.shape[0])
    num_users, E = user_emb.shape
    num_items, _ = item_emb.shape

    # Lane-dense batch tiling: multiple of 128, no larger than the padded batch.
    tile_b = max(128, (tile_b // 128) * 128)
    tile_b = min(tile_b, pl.cdiv(B, 128) * 128)
    num_tiles = pl.cdiv(B, tile_b)
    b_pad = num_tiles * tile_b

    u_idx = u_idx.astype(jnp.int32)
    v_idx = v_idx.astype(jnp.int32)
    if b_pad != B:
        # Pad with index 0 (a valid row); padded results are sliced off below.
        u_idx = jnp.pad(u_idx, (0, b_pad - B))
        v_idx = jnp.pad(v_idx, (0, b_pad - B))
    u_idx2d = u_idx.reshape(num_tiles, tile_b)
    v_idx2d = v_idx.reshape(num_tiles, tile_b)

    # Transposed tables: (E, U) / (E, V) so the gathered tiles are (E, TB).
    user_t = jnp.asarray(user_emb, jnp.float32).T
    item_t = jnp.asarray(item_emb, jnp.float32).T

    out = pl.pallas_call(
        mf_kernel,
        out_shape=jax.ShapeDtypeStruct((num_tiles, tile_b), jnp.float32),
        grid=(num_tiles,),
        in_specs=[
            pl.BlockSpec((1, tile_b), lambda i: (i, 0)),        # u index tile
            pl.BlockSpec((1, tile_b), lambda i: (i, 0)),        # v index tile
            pl.BlockSpec((E, num_users), lambda i: (0, 0)),     # user table, resident
            pl.BlockSpec((E, num_items), lambda i: (0, 0)),     # item table, resident
        ],
        out_specs=pl.BlockSpec((1, tile_b), lambda i: (i, 0)),
        compiler_params=pltpu.CompilerParams(
            dimension_semantics=("parallel",)),
    )(u_idx2d, v_idx2d, user_t, item_t)

    return out.reshape(-1)[:B]


def init_mf_params(key, num_users, num_items, emb_size):
    """Deterministic parameter init mirroring MF.__init__:
    user_emb/item_emb ~ Uniform(0, 0.05)."""
    ku, ki = jax.random.split(key)
    user_emb = jax.random.uniform(ku, (num_users, emb_size), jnp.float32,
                                  minval=0.0, maxval=0.05)
    item_emb = jax.random.uniform(ki, (num_items, emb_size), jnp.float32,
                                  minval=0.0, maxval=0.05)
    return user_emb, item_emb


if __name__ == "__main__":
    key = jax.random.PRNGKey(0)
    num_users, num_items, emb_size, batch = 50, 60, 32, 300

    kparam, ku, kv = jax.random.split(key, 3)
    user_emb, item_emb = init_mf_params(kparam, num_users, num_items, emb_size)

    u_idx = jax.random.randint(ku, (batch,), 0, num_users, dtype=jnp.int32)
    v_idx = jax.random.randint(kv, (batch,), 0, num_items, dtype=jnp.int32)

    y = mf_forward(u_idx, v_idx, user_emb, item_emb, tile_b=512)
    y = jax.block_until_ready(y)

    # Pure-JAX reference of the same forward pass (sanity check).
    ref = jnp.sum(user_emb[u_idx] * item_emb[v_idx], axis=1)
    np.testing.assert_allclose(np.asarray(y), np.asarray(ref),
                               rtol=1e-5, atol=1e-6)

    print("KERNEL_OK")
</pallas_src>

<mosaic_0001>
module attributes {stable_mosaic.version = 11 : i64} {
  func.func @mf_kernel(%arg0: i32, %arg1: memref<1x384xi32, #tpu.memory_space<vmem>>, %arg2: memref<1x384xi32, #tpu.memory_space<vmem>>, %arg3: memref<32x50xf32, #tpu.memory_space<vmem>>, %arg4: memref<32x60xf32, #tpu.memory_space<vmem>>, %arg5: memref<1x384xf32, #tpu.memory_space<vmem>>) attributes {dimension_semantics = [#tpu.dimension_semantics<parallel>], iteration_bounds = array<i64: 1>, scalar_prefetch = 0 : i64, scratch_operands = 0 : i64, tpu.core_type = #tpu.core_type<tc>, window_params = [{transform_indices = @transform_0, window_bounds = array<i64: 1, 384>}, {transform_indices = @transform_1, window_bounds = array<i64: 1, 384>}, {pipeline_mode = #tpu.pipeline_mode<synchronous>, transform_indices = @transform_2, window_bounds = array<i64: 32, 50>}, {pipeline_mode = #tpu.pipeline_mode<synchronous>, transform_indices = @transform_3, window_bounds = array<i64: 32, 60>}, {transform_indices = @transform_4, window_bounds = array<i64: 1, 384>}]} {
    %c0 = arith.constant 0 : index
    %c0_0 = arith.constant 0 : index
    %0 = vector.load %arg1[%c0, %c0_0] : memref<1x384xi32, #tpu.memory_space<vmem>>, vector<1x384xi32>
    %c0_1 = arith.constant 0 : index
    %c0_2 = arith.constant 0 : index
    %1 = vector.load %arg2[%c0_1, %c0_2] : memref<1x384xi32, #tpu.memory_space<vmem>>, vector<1x384xi32>
    %2 = tpu.iota {dimensions = array<i32: 0>} : vector<50x384xi32>
    %3 = vector.broadcast %0 : vector<1x384xi32> to vector<50x384xi32>
    %4 = arith.cmpi eq, %2, %3 : vector<50x384xi32>
    %5 = arith.extui %4 : vector<50x384xi1> to vector<50x384xi32>
    %6 = arith.sitofp %5 : vector<50x384xi32> to vector<50x384xf32>
    %c0_3 = arith.constant 0 : index
    %c0_4 = arith.constant 0 : index
    %7 = vector.load %arg3[%c0_3, %c0_4] : memref<32x50xf32, #tpu.memory_space<vmem>>, vector<32x50xf32>
    %cst = arith.constant dense<0.000000e+00> : vector<32x384xf32>
    %8 = tpu.matmul %7, %6, %cst {dimension_numbers = #tpu.dot_dimension_numbers<[1], [0], [0], [1], [0, 0, 1, 1], [], []>} : vector<32x50xf32>, vector<50x384xf32>, vector<32x384xf32> -> vector<32x384xf32>
    %9 = tpu.iota {dimensions = array<i32: 0>} : vector<60x384xi32>
    %10 = vector.broadcast %1 : vector<1x384xi32> to vector<60x384xi32>
    %11 = arith.cmpi eq, %9, %10 : vector<60x384xi32>
    %12 = arith.extui %11 : vector<60x384xi1> to vector<60x384xi32>
    %13 = arith.sitofp %12 : vector<60x384xi32> to vector<60x384xf32>
    %c0_5 = arith.constant 0 : index
    %c0_6 = arith.constant 0 : index
    %14 = vector.load %arg4[%c0_5, %c0_6] : memref<32x60xf32, #tpu.memory_space<vmem>>, vector<32x60xf32>
    %cst_7 = arith.constant dense<0.000000e+00> : vector<32x384xf32>
    %15 = tpu.matmul %14, %13, %cst_7 {dimension_numbers = #tpu.dot_dimension_numbers<[1], [0], [0], [1], [0, 0, 1, 1], [], []>} : vector<32x60xf32>, vector<60x384xf32>, vector<32x384xf32> -> vector<32x384xf32>
    %16 = arith.mulf %8, %15 : vector<32x384xf32>
    %cst_8 = arith.constant dense<0.000000e+00> : vector<384xf32>
    %17 = vector.multi_reduction <add>, %16, %cst_8 [0] : vector<32x384xf32> to vector<384xf32>
    %18 = vector.shape_cast %17 : vector<384xf32> to vector<1x384xf32>
    %c0_9 = arith.constant 0 : index
    %c0_10 = arith.constant 0 : index
    %19 = vector.load %arg5[%c0_9, %c0_10] : memref<1x384xf32, #tpu.memory_space<vmem>>, vector<1x384xf32>
    tpu.vector_store %arg5[%c0_9, %c0_10], %18 {strides = array<i32>} : memref<1x384xf32, #tpu.memory_space<vmem>>, vector<1x384xf32>,
    return
  }
  func.func @transform_0(%arg0: i32) -> (i32, i32) {
    %c0_i32 = arith.constant 0 : i32
    %c0_i32_0 = arith.constant 0 : i32
    return %arg0, %c0_i32 : i32, i32
  }
  func.func @transform_1(%arg0: i32) -> (i32, i32) {
    %c0_i32 = arith.constant 0 : i32
    %c0_i32_0 = arith.constant 0 : i32
    return %arg0, %c0_i32 : i32, i32
  }
  func.func @transform_2(%arg0: i32) -> (i32, i32) {
    %c0_i32 = arith.constant 0 : i32
    %c0_i32_0 = arith.constant 0 : i32
    %c0_i32_1 = arith.constant 0 : i32
    return %c0_i32, %c0_i32_0 : i32, i32
  }
  func.func @transform_3(%arg0: i32) -> (i32, i32) {
    %c0_i32 = arith.constant 0 : i32
    %c0_i32_0 = arith.constant 0 : i32
    %c0_i32_1 = arith.constant 0 : i32
    return %c0_i32, %c0_i32_0 : i32, i32
  }
  func.func @transform_4(%arg0: i32) -> (i32, i32) {
    %c0_i32 = arith.constant 0 : i32
    %c0_i32_0 = arith.constant 0 : i32
    return %arg0, %c0_i32 : i32, i32
  }
}

</mosaic_0001>

<bundles_post_ra>
// kernel: tpu_custom_call.1
= control target key start
LH: loop header
LB: loop body
LE: loop exit
PB: predicated region body
PF: predicated region fallthrough
CT: control target
= control target key end

     0   :  { %9 = vsyncpa [#allocation3], 0  ;;  %s1384_s0 = inlined_call_operand.hbm [shape: s32[1,384], index: 0, kind: input, shape index: {}]   ;;  %s1385_s1 = inlined_call_operand.vmem [shape: s32[1,384], index: 1, kind: input, shape index: {}]   ;;  %s1386_s2 = inlined_call_operand.hbm [shape: f32[32,50], index: 2, kind: input, shape index: {}]   ;;  %s1387_s3 = inlined_call_operand.hbm [shape: f32[32,60], index: 3, kind: input, shape index: {}]   ;;  %s1388_s4 = inlined_call_operand.hbm [shape: f32[1,384], index: 4, kind: output, shape index: {}]  }
   0x1   :  { %10 = vsyncpa [#allocation6], 0 }
   0x2   :  { %11 = vsyncpa [#allocation4], 0  ;;  %s1051_s15 = smov [#allocation5]   ;;  %s957_s19 = scalar_lea.hbm %s1386_s2, 512 }
   0x3   :  { %s29_s16 = sshll.u32 %s1051_s15, 4  ;;  %p958_p0 = scmp.ne.s32.totalorder %s1386_s2, %s957_s19  ;;  %s30_s16 = int_to_ptr.vmem [resolvable:$true] %s29_s16 }
   0x4   :  { %p961_p1 = scmp.lt.u32.totalorder %s957_s19, %s1386_s2 }
   0x6   :  { %p963_p2 = pnand %p961_p1, %p958_p0 }
   0x8   :  { %966 = shalt.err (!%p963_p2)
}
   0x9   :  { %s967_s24 = scalar_lea.vmem %s30_s16, 512  ;;  %p972_p4 = scmp.lt.s32.totalorder %s30_s16, %s30_s16 }
   0xa   :  { %p968_p3 = scmp.ne.s32.totalorder %s30_s16, %s967_s24  ;;  %p973_p5 = scmp.lt.s32.totalorder %s967_s24, %s967_s24 }
   0xc   :  { %p974_p6 = por %p973_p5, %p972_p4 }
   0xe   :  { %p975_p7 = pnand %p974_p6, %p968_p3 }
  0x10   :  { %978 = shalt.err (!%p975_p7)
}
  0x11   :  { %s1052_s25 = smov 128   ;;  %s1053_s26 = smov 8  }
  0x12   :  { %35 = dma.hbm_to_vmem [thread:$0]  %s1386_s2, 512, %s30_s16, [#allocation6], %s1052_s25, %s1052_s25, %s1053_s26  }
  0x13   :  { %s1054_s29 = smov [#allocation2]   ;;  %s1055_s5 = smov [#allocation7]  }
  0x14   :  { %s18_s30 = sshll.u32 %s1054_s29, 4  ;;  %s41_s6 = sshll.u32 %s1055_s5, 4  ;;  %s19_s30 = int_to_ptr.vmem [resolvable:$true] %s18_s30  ;;  %s42_s6 = int_to_ptr.vmem [resolvable:$true] %s41_s6 }
  0x15   :  { %s979_s9 = scalar_lea.hbm %s1384_s0, 48 }
  0x16   :  { %p980_p8 = scmp.ne.s32.totalorder %s1384_s0, %s979_s9  ;;  %p983_p9 = scmp.lt.u32.totalorder %s979_s9, %s1384_s0 }
  0x18   :  { %p985_p10 = pnand %p983_p9, %p980_p8 }
  0x1a   :  { %988 = shalt.err (!%p985_p10)
}
  0x1b   :  { %s989_s2 = scalar_lea.vmem %s19_s30, 48  ;;  %s993_s14 = scalar_lea.vmem %s19_s30, 64 }
  0x1c   :  { %p990_p11 = scmp.ne.s32.totalorder %s19_s30, %s989_s2  ;;  %p994_p12 = scmp.lt.s32.totalorder %s19_s30, %s19_s30 }
  0x1d   :  { %p995_p13 = scmp.lt.s32.totalorder %s993_s14, %s989_s2 }
  0x1f   :  { %p996_p0 = por %p995_p13, %p994_p12 }
  0x21   :  { %p997_p1 = pnand %p996_p0, %p990_p11 }
  0x23   :  { %1000 = shalt.err (!%p997_p1)
}
  0x24   :  { %21 = dma.hbm_to_vmem [thread:$0]  %s1384_s0, 48, %s19_s30, [#allocation3]  }
  0x25   :  { %s1001_s19 = scalar_lea.hbm %s1387_s3, 512 }
  0x26   :  { %p1002_p2 = scmp.ne.s32.totalorder %s1387_s3, %s1001_s19  ;;  %p1005_p3 = scmp.lt.u32.totalorder %s1001_s19, %s1387_s3 }
  0x28   :  { %p1007_p4 = pnand %p1005_p3, %p1002_p2 }
  0x2a   :  { %1010 = shalt.err (!%p1007_p4)
}
  0x2b   :  { %s1011_s24 = scalar_lea.vmem %s42_s6, 512  ;;  %p1016_p6 = scmp.lt.s32.totalorder %s42_s6, %s42_s6 }
  0x2c   :  { %p1012_p5 = scmp.ne.s32.totalorder %s42_s6, %s1011_s24  ;;  %p1017_p7 = scmp.lt.s32.totalorder %s1011_s24, %s1011_s24 }
  0x2e   :  { %p1018_p8 = por %p1017_p7, %p1016_p6 }
  0x30   :  { %p1019_p9 = pnand %p1018_p8, %p1012_p5 }
  0x32   :  { %1022 = shalt.err (!%p1019_p9)
}
  0x33   :  { %47 = dma.hbm_to_vmem [thread:$0]  %s1387_s3, 512, %s42_s6, [#allocation6], %s1052_s25, %s1052_s25, %s1053_s26  }
  0x34   :  { %1045 = dma.done.wait [#allocation3], 48  }
  0x35   :  { %1046 = vsyncadd [#allocation3], 4294967248 }
  0x36   :  { %1047 = dma.done.wait [#allocation6], 1024  }
  0x37   :  { %1048 = vsyncadd [#allocation6], 4294966272  ;;  %v59_v0 = vlaneseq  ;;  %v1056_v1 = vmov 0.0   ;;  %vm1389_vm0 = vcmask 408576   ;;  %v57_v7 = vld [vmem:[#allocation2] sm:$0x7] }
  0x38   :  { %233 = vmatprep.mubr.f32.mxu0 %v1056_v1  ;;  %v1144_v10 = vld [vmem:[#allocation5] sm:$0xff]  ;;  %v1057_v16 = vmov 1.0|1.0   ;;  %v58_v18 = vld [vmem:[%s1385_s1] sm:$0x7]  ;;  %v143_v27 = vld [vmem:[#allocation5 + $0x8] sm:$0xff] }
  0x39   :  { %v1130_v2 = vshrl.u32 %v59_v0, 7  ;;  %859 = vmatprep.mubr.msk.f32.mxu1 %vm1389_vm0, %v1144_v10  ;;  %v144_v31 = vld [vmem:[#allocation5 + $0x10] sm:$0xff]  ;;  %v145_v35 = vld [vmem:[#allocation5 + $0x18] sm:$0xff]  ;;  %v428_v37 = vld [vmem:[#allocation7] sm:$0xff]  ;;  %v1058_v38 = vmov 1.0   ;;  %s1060_s1 = smov [#allocation8]  }
  0x3a   :  { %v429_v43 = vld [vmem:[#allocation7 + $0x8] sm:$0xff]  ;;  %v430_v44 = vld [vmem:[#allocation7 + $0x10] sm:$0xff]  ;;  %v431_v45 = vld [vmem:[#allocation7 + $0x18] sm:$0xff]  ;;  %s706_s26 = sshll.u32 %s1060_s1, 4  ;;  %s707_s26 = int_to_ptr.vmem [resolvable:$true] %s706_s26 }
  0x3b   :  { %v73_v3 = vsub.s32 1, %v1130_v2  ;;  %v77_v4 = vsub.s32 2, %v1130_v2  ;;  %v69_v5 = vsub.s32 0, %v1130_v2  ;;  %v1136_v6 = vadd.s32 8, %v1130_v2  ;;  %s1023_s28 = scalar_lea.vmem %s707_s26, 48  ;;  %s1027_s29 = scalar_lea.vmem %s707_s26, 64 }
  0x3c   :  { %v1139_v8 = vadd.s32 16, %v1130_v2  ;;  %v1142_v9 = vadd.s32 24, %v1130_v2  ;;  %v1149_v14 = vadd.s32 32, %v1130_v2  ;;  %v1152_v15 = vadd.s32 40, %v1130_v2  ;;  %p1024_p10 = scmp.ne.s32.totalorder %s707_s26, %s1023_s28  ;;  %p1028_p11 = scmp.lt.s32.totalorder %s707_s26, %s707_s26 }
  0x3d   :  { %v74_v11 = vrot.slane %v57_v7, %v73_v3  ;;  %v78_v12 = vrot.slane %v57_v7, %v77_v4  ;;  %v70_v13 = vrot.slane %v57_v7, %v69_v5  ;;  %v1169_v17 = vadd.s32 48, %v1130_v2  ;;  %p1029_p12 = scmp.lt.s32.totalorder %s1027_s29, %s1023_s28 }
  0x3e   :  { %v1186_v19 = vrot.slane %v58_v18, %v73_v3  ;;  %v1190_v20 = vrot.slane %v58_v18, %v77_v4  ;;  %v1194_v21 = vrot.slane %v58_v18, %v69_v5  ;;  %v343_v25 = vadd.s32 56, %v1130_v2 }
  0x3f   :  { %vm80_vm1 = vcmp.eq.s32.totalorder %v1130_v2, %v74_v11  ;;  %vm83_vm2 = vcmp.eq.s32.totalorder %v1136_v6, %v74_v11  ;;  %vm81_vm3 = vcmp.eq.s32.totalorder %v1130_v2, %v78_v12  ;;  %vm84_vm4 = vcmp.eq.s32.totalorder %v1136_v6, %v78_v12  ;;  %p1030_p13 = por %p1029_p12, %p1028_p11 }
  0x40   :  { %vm887_vm5 = vmpackc.low %vm83_vm2, %vm80_vm1  ;;  %vm79_vm6 = vcmp.eq.s32.totalorder %v1130_v2, %v70_v13  ;;  %vm82_vm7 = vcmp.eq.s32.totalorder %v1136_v6, %v70_v13  ;;  %vm86_vm8 = vcmp.eq.s32.totalorder %v1139_v8, %v74_v11  ;;  %vm89_vm9 = vcmp.eq.s32.totalorder %v1142_v9, %v74_v11 }
  0x41   :  { %888 = vmatprep.subr.msk.bf16.mxu0 %vm887_vm5, %v1057_v16  ;;  %vm899_vm10 = vmpackc.low %vm84_vm4, %vm81_vm3  ;;  %vm87_vm11 = vcmp.eq.s32.totalorder %v1139_v8, %v78_v12  ;;  %vm90_vm12 = vcmp.eq.s32.totalorder %v1142_v9, %v78_v12  ;;  %vm85_vm14 = vcmp.eq.s32.totalorder %v1139_v8, %v70_v13  ;;  %vm88_vm15 = vcmp.eq.s32.totalorder %v1142_v9, %v70_v13  ;;  %p1031_p0 = pnand %p1030_p13, %p1024_p10 }
  0x42   :  { %900 = vmatprep.subr.msk.bf16.mxu1 %vm899_vm10, %v1057_v16  ;;  %vm889_vm13 = vmpackc.low %vm82_vm7, %vm79_vm6  ;;  %vm92_vm2 = vcmp.eq.s32.totalorder %v1149_v14, %v74_v11  ;;  %vm95_vm3 = vcmp.eq.s32.totalorder %v1152_v15, %v74_v11  ;;  %vm93_vm5 = vcmp.eq.s32.totalorder %v1149_v14, %v78_v12  ;;  %vm96_vm6 = vcmp.eq.s32.totalorder %v1152_v15, %v78_v12 }
  0x43   :  { %890 = vmatpush1.bf16.msk.msra.mxu0 %vm889_vm13, %v1057_v16  ;;  %902 = vmatpush3.bf16.msk.msra.mxu1 %vm899_vm10, %v1057_v16  ;;  %vm891_vm1 = vmpackc.low %vm89_vm9, %vm86_vm8  ;;  %vm91_vm13 = vcmp.eq.s32.totalorder %v1149_v14, %v70_v13  ;;  %vm94_vm10 = vcmp.eq.s32.totalorder %v1152_v15, %v70_v13  ;;  %vm98_vm9 = vcmp.eq.s32.totalorder %v1169_v17, %v74_v11 }
  0x44   :  { %892 = vmatprep.subr.msk.bf16.mxu0 %vm891_vm1, %v1057_v16  ;;  %vm903_vm4 = vmpackc.low %vm90_vm12, %vm87_vm11  ;;  %vm99_vm0 = vcmp.eq.s32.totalorder %v1169_v17, %v78_v12  ;;  %v735_v22 = vsel %vm98_vm9, 1.0, %v1056_v1  ;;  %vm357_vm1 = vcmp.eq.s32.totalorder %v1130_v2, %v1186_v19  ;;  %vm367_vm9 = vcmp.eq.s32.totalorder %v1142_v9, %v1190_v20 }
  0x45   :  { %904 = vmatprep.subr.msk.bf16.mxu1 %vm903_vm4, %v1057_v16  ;;  %vm893_vm7 = vmpackc.low %vm88_vm15, %vm85_vm14  ;;  %vm159_vm14 = vcmask 1041408   ;;  %v736_v23 = vsel %vm99_vm0, 1.0, %v1056_v1  ;;  %vm97_vm15 = vcmp.eq.s32.totalorder %v1169_v17, %v70_v13  ;;  %vm356_vm0 = vcmp.eq.s32.totalorder %v1130_v2, %v1194_v21 }
  0x46   :  { %vm895_vm8 = vmpackc.low %vm95_vm3, %vm92_vm2  ;;  %vm360_vm2 = vcmp.eq.s32.totalorder %v1136_v6, %v1186_v19  ;;  %vm358_vm3 = vcmp.eq.s32.totalorder %v1130_v2, %v1190_v20  ;;  %v734_v24 = vsel %vm97_vm15, 1.0, %v1056_v1  ;;  %vm365_vm15 = vcmp.eq.s32.totalorder %v1142_v9, %v1194_v21 }
  0x47   :  { %894 = vmatpush1.bf16.msk.msra.mxu0 %vm893_vm7, %v1057_v16  ;;  %906 = vmatpush3.bf16.msk.msra.mxu1 %vm903_vm4, %v1057_v16  ;;  %vm907_vm11 = vmpackc.low %vm96_vm6, %vm93_vm5  ;;  %vm361_vm4 = vcmp.eq.s32.totalorder %v1136_v6, %v1190_v20  ;;  %vm359_vm5 = vcmp.eq.s32.totalorder %v1136_v6, %v1194_v21  ;;  %vm363_vm7 = vcmp.eq.s32.totalorder %v1139_v8, %v1186_v19 }
  0x48   :  { %896 = vmatprep.subr.msk.bf16.mxu0 %vm895_vm8, %v1057_v16  ;;  %908 = vmatprep.subr.msk.bf16.mxu1 %vm907_vm11, %v1057_v16  ;;  %vm897_vm12 = vmpackc.low %vm94_vm10, %vm91_vm13  ;;  %vm366_vm13 = vcmp.eq.s32.totalorder %v1142_v9, %v1186_v19  ;;  %vm364_vm8 = vcmp.eq.s32.totalorder %v1139_v8, %v1190_v20 }
  0x49   :  { %vm911_vm6 = vmpackc.low %vm360_vm2, %vm357_vm1  ;;  %vm1392_vm1 = vcmask 408576  }
  0x4a   :  { %vm1223_vm10 = vmpackc.low %vm361_vm4, %vm358_vm3  ;;  %vm369_vm3 = vcmp.eq.s32.totalorder %v1149_v14, %v1186_v19  ;;  %vm372_vm4 = vcmp.eq.s32.totalorder %v1152_v15, %v1186_v19 }
  0x4b   :  { %898 = vmatpush1.bf16.msk.msra.mxu0 %vm897_vm12, %v1057_v16  ;;  %910 = vmatpush3.bf16.msk.msra.mxu1 %vm907_vm11, %v1057_v16  ;;  %vm913_vm11 = vmpackc.low %vm359_vm5, %vm356_vm0  ;;  %vm362_vm12 = vcmp.eq.s32.totalorder %v1139_v8, %v1194_v21 }
  0x4c   :  { %749 = vmatprep.subr.msk.mxu0 %vm159_vm14, %v735_v22  ;;  %857 = vmatprep.subr.msk.mxu1 %vm159_vm14, %v736_v23  ;;  %vm915_vm2 = vmpackc.low %vm366_vm13, %vm363_vm7  ;;  %vm378_vm7 = vcmp.eq.s32.totalorder %v343_v25, %v1186_v19  ;;  %vm379_vm13 = vcmp.eq.s32.totalorder %v343_v25, %v1190_v20 }
  0x4d   :  { %vm1393_vm0 = vmmov %vm1392_vm1  ;;  %v788_v33 = vsel %vm378_vm7, 1.0, %v1056_v1  ;;  %v789_v34 = vsel %vm379_vm13, 1.0, %v1056_v1 }
  0x4e   :  { %vm1253_vm5 = vmpackc.low %vm367_vm9, %vm364_vm8  ;;  %v923_v39 = vpack.c.bf16 %v788_v33, %v1058_v38  ;;  %v941_v40 = vpack.c.bf16 %v789_v34, %v1058_v38 }
  0x4f   :  { %750 = vmatpush1.msk.msra.mxu0 %vm159_vm14, %v734_v24  ;;  %858 = vmatpush3.msk.msra.mxu1 %vm159_vm14, %v736_v23  ;;  %vm370_vm14 = vcmp.eq.s32.totalorder %v1149_v14, %v1190_v20  ;;  %vm1271_vm8 = vmpackc.low %vm365_vm15, %vm362_vm12  ;;  %vm375_vm15 = vcmp.eq.s32.totalorder %v1169_v17, %v1186_v19 }
  0x50   :  { %751 = vmatmul.mubr.msk.f32.vlgmr.msra.gmra.mrb[0].mxu0 %vm1392_vm1, %v1144_v10  ;;  %912 = vmatprep.subr.msk.bf16.mxu0 %vm911_vm6, %v1057_v16  ;;  %vm373_vm6 = vcmp.eq.s32.totalorder %v1152_v15, %v1190_v20  ;;  %vm1277_vm9 = vmpackc.low %vm372_vm4, %vm369_vm3  ;;  %vm445_vm1 = vcmask 1043456   ;;  %vm376_vm4 = vcmp.eq.s32.totalorder %v1169_v17, %v1190_v20 }
  0x51   :  { %930 = vmatprep.subr.msk.bf16.mxu1 %vm1223_vm10, %v1057_v16  ;;  %860 = vmatmul.mubr.msk.f32.vlgmr.msra.gmra.mrb[0].mxu1 %vm1393_vm0, %v143_v27  ;;  %vm1295_vm12 = vmpackc.low %vm373_vm6, %vm370_vm14  ;;  %vm432_vm6 = vcmask 490496  }
  0x52   :  { %914 = vmatpush1.bf16.msk.msra.mxu0 %vm913_vm11, %v1057_v16  ;;  %932 = vmatpush3.bf16.msk.msra.mxu1 %vm1223_vm10, %v1057_v16  ;;  %vm368_vm10 = vcmp.eq.s32.totalorder %v1149_v14, %v1194_v21  ;;  %vm371_vm11 = vcmp.eq.s32.totalorder %v1152_v15, %v1194_v21  ;;  %vm1402_vm3 = vmmov %vm1393_vm0 }
  0x53   :  { %239 = vmatprep.mubr.f32.mxu0 %v1056_v1  ;;  %916 = vmatprep.subr.msk.bf16.mxu0 %vm915_vm2, %v1057_v16  ;;  %vm377_vm2 = vcmp.eq.s32.totalorder %v343_v25, %v1194_v21  ;;  %vm1324_vm14 = vmpackc.low %vm371_vm11, %vm368_vm10 }
  0x54   :  { %752 = vmatmul.mubr.msk.f32.gmra.mrb[2].mxu0 %vm1393_vm0, %v143_v27  ;;  %934 = vmatprep.subr.msk.bf16.mxu1 %vm1253_vm5, %v1057_v16  ;;  %v787_v41 = vsel %vm377_vm2, 1.0, %v1056_v1  ;;  %vm1405_vm7 = vmmov %vm1393_vm0 }
  0x55   :  { %245 = vmatprep.mubr.f32.mxu0 %v1056_v1  ;;  %862 = vmatprep.mubr.msk.f32.mxu1 %vm1402_vm3, %v144_v31  ;;  %vm1406_vm13 = vmmov %vm1393_vm0  ;;  %v926_v42 = vpack.c.bf16 %v787_v41, %v1058_v38 }
  0x56   :  { %918 = vmatpush1.bf16.msk.msra.mxu0 %vm1271_vm8, %v1057_v16  ;;  %936 = vmatpush3.bf16.msk.msra.mxu1 %vm1253_vm5, %v1057_v16  ;;  %vm924_vm5 = vmpackc.low %vm445_vm1, %vm375_vm15 }
  0x57   :  { %920 = vmatprep.subr.msk.bf16.mxu0 %vm1277_vm9, %v1057_v16  ;;  %938 = vmatprep.subr.msk.bf16.mxu1 %vm1295_vm12, %v1057_v16  ;;  %vm942_vm8 = vmpackc.low %vm445_vm1, %vm376_vm4  ;;  %vm374_vm9 = vcmp.eq.s32.totalorder %v1169_v17, %v1194_v21 }
  0x58   :  { %753 = vmatmul.mubr.msk.f32.gmra.mrb[4].mxu0 %vm1405_vm7, %v144_v31  ;;  %863 = vmatmul.mubr.msk.f32.gmra.mrb[2].mxu1 %vm1406_vm13, %v145_v35  ;;  %vm927_vm10 = vmpackc.low %vm445_vm1, %vm374_vm9  ;;  %vm697_vm1 = vcmp.lt.s32.totalorder %v59_v0, 384 }
  0x59   :  { %251 = vmatprep.mubr.f32.mxu0 %v1056_v1  ;;  %881 = vmatprep.mubr.msk.f32.mxu1 %vm432_vm6, %v428_v37  ;;  %vm1407_vm11 = vmmov %vm1393_vm0 }
  0x5a   :  { %922 = vmatpush1.bf16.msk.msra.mxu0 %vm1324_vm14, %v1057_v16  ;;  %940 = vmatpush3.bf16.msk.msra.mxu1 %vm1295_vm12, %v1057_v16 }
  0x5b   :  { %925 = vmatprep.subr.msk.bf16.mxu0 %vm924_vm5, %v923_v39  ;;  %943 = vmatprep.subr.msk.bf16.mxu1 %vm942_vm8, %v941_v40 }
  0x5c   :  { %754 = vmatmul.mubr.msk.f32.gmra.mrb[6].mxu0 %vm1407_vm11, %v145_v35 }
  0x5d   :  { %519 = vmatprep.mubr.f32.mxu0 %v1056_v1 }
  0x5e   :  { %928 = vmatpush1.bf16.msk.msra.mxu0 %vm927_vm10, %v926_v42  ;;  %946 = vmatpush3.bf16.msk.msra.mxu1 %vm942_vm8, %v941_v40 }
  0x61   :  { %806 = vmatmul.mubr.msk.f32.vlgmr.msra.gmra.mrb[8].mxu0 %vm432_vm6, %v428_v37  ;;  %882 = vmatmul.mubr.msk.f32.vlgmr.msra.gmra.mrb[4].mxu1 %vm432_vm6, %v429_v43  ;;  %v1059_v37 = vmov 1966171168  }
  0x62   :  { %525 = vmatprep.mubr.f32.mxu0 %v1056_v1  ;;  %884 = vmatprep.mubr.msk.f32.mxu1 %vm432_vm6, %v430_v44  ;;  %v673_v38 = vunpack.c.l.s4 %v1059_v37 }
  0x65   :  { %807 = vmatmul.mubr.msk.f32.gmra.mrb[10].mxu0 %vm432_vm6, %v429_v43  ;;  %885 = vmatmul.mubr.msk.f32.gmra.mrb[6].mxu1 %vm432_vm6, %v431_v45 }
  0x66   :  { %531 = vmatprep.mubr.f32.mxu0 %v1056_v1 }
  0x69   :  { %808 = vmatmul.mubr.msk.f32.gmra.mrb[12].mxu0 %vm432_vm6, %v430_v44  ;;  %v674_v44 = vunpack.c.0.s8 %v673_v38 }
  0x6a   :  { %537 = vmatprep.mubr.f32.mxu0 %v1056_v1 }
  0x6d   :  { %809 = vmatmul.mubr.msk.f32.gmra.mrb[14].mxu0 %vm432_vm6, %v431_v45 }
 0x123   :  { %v235_v46 = vpop.f32.mrb[0].mxu0 }
 0x124   :  { %v237_v47 = vpop.f32.mrb[1].mxu0  ;;  %v861_v48 = vpop.f32.mrb[0].mxu1 }
 0x125   :  { %v324_v49 = vpop.f32.mrb[1].mxu1 }
 0x127   :  { %v241_v50 = vpop.f32.mrb[2].mxu0 }
 0x128   :  { %v243_v51 = vpop.f32.mrb[3].mxu0 }
 0x12b   :  { %v247_v52 = vpop.f32.mrb[4].mxu0  ;;  %v864_v53 = vpop.f32.mrb[2].mxu1 }
 0x12c   :  { %v249_v54 = vpop.f32.mrb[5].mxu0  ;;  %v334_v55 = vpop.f32.mrb[3].mxu1 }
 0x12f   :  { %v253_v56 = vpop.f32.mrb[6].mxu0 }
 0x130   :  { %v255_v57 = vpop.f32.mrb[7].mxu0 }
 0x134   :  { %v521_v58 = vpop.f32.mrb[8].mxu0  ;;  %v883_v59 = vpop.f32.mrb[4].mxu1 }
 0x135   :  { %v629_v60 = vmul.f32 %v521_v58, %v235_v46  ;;  %v634_v61 = vmul.f32 %v883_v59, %v861_v48  ;;  %v523_v62 = vpop.f32.mrb[9].mxu0  ;;  %v610_v63 = vpop.f32.mrb[5].mxu1 }
 0x136   :  { %v630_v1 = vmul.f32 %v523_v62, %v237_v47  ;;  %v631_v3 = vmul.f32 %v610_v63, %v324_v49 }
 0x138   :  { %v659_v4 = vadd.f32 %v634_v61, %v631_v3  ;;  %v527_v5 = vpop.f32.mrb[10].mxu0  ;;  %v886_v6 = vpop.f32.mrb[6].mxu1 }
 0x139   :  { %v632_v7 = vmul.f32 %v527_v5, %v241_v50  ;;  %v640_v8 = vmul.f32 %v886_v6, %v864_v53  ;;  %v529_v9 = vpop.f32.mrb[11].mxu0  ;;  %v620_v10 = vpop.f32.mrb[7].mxu1  ;;  %v677_v50 = vsub.s32 %v674_v44, %v1130_v2 }
 0x13a   :  { %v633_v11 = vmul.f32 %v529_v9, %v243_v51  ;;  %v637_v12 = vmul.f32 %v620_v10, %v334_v55 }
 0x13b   :  { %v641_v13 = vadd.f32 %v632_v7, %v629_v60 }
 0x13c   :  { %v650_v14 = vadd.f32 %v633_v11, %v630_v1  ;;  %v660_v15 = vadd.f32 %v659_v4, %v637_v12  ;;  %v533_v16 = vpop.f32.mrb[12].mxu0 }
 0x13d   :  { %v635_v17 = vmul.f32 %v533_v16, %v247_v52  ;;  %v535_v18 = vpop.f32.mrb[13].mxu0 }
 0x13e   :  { %v661_v19 = vadd.f32 %v660_v15, %v640_v8  ;;  %v636_v20 = vmul.f32 %v535_v18, %v249_v54 }
 0x13f   :  { %v642_v21 = vadd.f32 %v641_v13, %v635_v17 }
 0x140   :  { %v662_v22 = vrot.slane %v661_v19, 4  ;;  %v651_v23 = vadd.f32 %v650_v14, %v636_v20  ;;  %v539_v24 = vpop.f32.mrb[14].mxu0 }
 0x141   :  { %v638_v25 = vmul.f32 %v539_v24, %v253_v56  ;;  %v541_v26 = vpop.f32.mrb[15].mxu0 }
 0x142   :  { %v663_v27 = vadd.f32 %v662_v22, %v661_v19  ;;  %v639_v28 = vmul.f32 %v541_v26, %v255_v57 }
 0x143   :  { %v643_v29 = vadd.f32 %v642_v21, %v638_v25 }
 0x144   :  { %v664_v30 = vrot.slane %v663_v27, 2  ;;  %v652_v31 = vadd.f32 %v651_v23, %v639_v28 }
 0x145   :  { %v644_v32 = vrot.slane %v643_v29, 4 }
 0x146   :  { %v653_v33 = vrot.slane %v652_v31, 4  ;;  %v665_v35 = vadd.f32 %v664_v30, %v663_v27 }
 0x147   :  { %v645_v34 = vadd.f32 %v644_v32, %v643_v29 }
 0x148   :  { %v654_v36 = vadd.f32 %v653_v33, %v652_v31  ;;  %v666_v42 = vrot.slane %v665_v35, 1 }
 0x149   :  { %v646_v39 = vrot.slane %v645_v34, 2 }
 0x14a   :  { %v655_v40 = vrot.slane %v654_v36, 2  ;;  %v667_v48 = vadd.f32 %v666_v42, %v665_v35 }
 0x14b   :  { %v647_v41 = vadd.f32 %v646_v39, %v645_v34 }
 0x14c   :  { %v656_v43 = vadd.f32 %v655_v40, %v654_v36  ;;  %v685_v53 = vrot.slane %v667_v48, %v677_v50 }
 0x14d   :  { %v648_v45 = vrot.slane %v647_v41, 1 }
 0x14e   :  { %v657_v46 = vrot.slane %v656_v43, 1 }
 0x14f   :  { %v649_v47 = vadd.f32 %v648_v45, %v647_v41 }
 0x150   :  { %v658_v49 = vadd.f32 %v657_v46, %v656_v43 }
 0x152   :  { %v671_v51 = vcombine.low %v649_v47, %v658_v49 }
 0x154   :  { %v678_v52 = vrot.slane %v671_v51, %v677_v50 }
 0x156   :  { %v686_v54 = vcombine.low %v678_v52, %v685_v53 }
 0x158   :  { %v693_v55 = vrot.slane %v686_v54, %v677_v50 }
 0x15a   :  { %699 = vst.msk [vmem:[#allocation8] sm:$0x7] %vm697_vm1, %v693_v55 }
 0x15b   :  { %1034 = shalt.err (!%p1031_p0)
}
 0x15c   :  { %s1035_s6 = scalar_lea.hbm %s1388_s4, 48 }
 0x15d   :  { %p1036_p1 = scmp.ne.s32.totalorder %s1388_s4, %s1035_s6  ;;  %p1039_p2 = scmp.lt.u32.totalorder %s1035_s6, %s1388_s4 }
 0x15f   :  { %p1041_p3 = pnand %p1039_p2, %p1036_p1 }
 0x161   :  { %1044 = shalt.err (!%p1041_p3)
}
 0x162   :  { %709 = dma.vmem_to_hbm [thread:$0]  %s707_s26, 48, %s1388_s4, [#allocation4]  }
 0x163   :  { %1049 = dma.done.wait [#allocation4], 48  }
 0x164   :  { %1050 = vsyncadd [#allocation4], 4294967248 }
 0x165   :  { %713 = vsyncpa [#allocation3], 1 }
 0x166   :  { %714 = vsyncpa [#allocation6], 1 }
 0x167   :  { %715 = vsyncpa [#allocation4], 1 }

</bundles_post_ra>
